<compile_context>
chip_gen: v7x
topology: tpu7x:2x2x1
jax: 0.10.0
libtpu: 0.0.40
codegen_flags: <defaults>
</compile_context>

<pallas_src>
import functools

import jax
import jax.numpy as jnp
from jax.experimental import pallas as pl
from jax.experimental.pallas import tpu as pltpu


# ----------------------------------------------------------------------------
# helpers
# ----------------------------------------------------------------------------
def _layernorm(x, g, b, eps=1e-5):
    mu = jnp.mean(x, axis=-1, keepdims=True)
    var = jnp.mean((x - mu) ** 2, axis=-1, keepdims=True)
    return (x - mu) * jax.lax.rsqrt(var + eps) * g + b


def _softmax_lastdim(x):
    m = jnp.max(x, axis=-1, keepdims=True)
    e = jnp.exp(x - m)
    return e * pl.reciprocal(jnp.sum(e, axis=-1, keepdims=True), approx=True)


def _resident_spec(arr):
    """Whole-array block with a constant index_map: weight stays VMEM-resident."""
    n = arr.ndim
    return pl.BlockSpec(arr.shape, lambda b, _n=n: (0,) * _n)


# ----------------------------------------------------------------------------
# Kernel 1: synthetic transformer encoder layer (stand-in for AutoModel)
#           + fused MoE gate.  Grid over the batch dim, one batch row per step.
# TODO(synk): pretrained AutoModel encoder replaced by a synthetic
#             deterministic 1-layer / 1-head transformer with the same
#             (input_ids, attention_mask) -> last_hidden_state[:, 0] interface.
# ----------------------------------------------------------------------------
def encoder_gate_kernel(x_ref, negmask_ref,
                        wqt_ref, bq_ref, wkt_ref, bk_ref, wvt_ref, bv_ref,
                        wot_ref, bo_ref, ln1_g_ref, ln1_b_ref,
                        wf1t_ref, bf1_ref, wf2t_ref, bf2_ref,
                        ln2_g_ref, ln2_b_ref, wgt_ref, bg_ref,
                        cls_ref, topw_ref, topi_ref, *, num_experts):
    x = x_ref[0]                                   # (S, H) bf16 -- one batch row
    H = x.shape[-1]
    x_cls = x[0:1, :]                              # (1, H) CLS token (static slice)

    # K/V need every token; Q only for the CLS query (downstream consumes only
    # hidden[:, 0]) -> attention is O(S) instead of O(S^2) per row.
    k = jnp.dot(x, wkt_ref[...], preferred_element_type=jnp.float32) + bk_ref[...]
    v = jnp.dot(x, wvt_ref[...], preferred_element_type=jnp.float32) + bv_ref[...]
    q = jnp.dot(x_cls, wqt_ref[...], preferred_element_type=jnp.float32) + bq_ref[...]

    scale = 1.0 / (float(H) ** 0.5)                # constant multiply, no divide
    scores = jnp.einsum('qh,kh->qk',
                        (q * scale).astype(jnp.bfloat16), k.astype(jnp.bfloat16),
                        preferred_element_type=jnp.float32)        # (1, S)
    scores = scores + negmask_ref[0]               # (1, S) additive key mask
    p_attn = _softmax_lastdim(scores)              # f32 softmax, approx recip (EUP)
    ctx = jnp.dot(p_attn.astype(jnp.bfloat16), v.astype(jnp.bfloat16),
                  preferred_element_type=jnp.float32)              # (1, H)

    attn_out = jnp.dot(ctx.astype(jnp.bfloat16), wot_ref[...],
                       preferred_element_type=jnp.float32) + bo_ref[...]
    h1 = _layernorm(x_cls.astype(jnp.float32) + attn_out,
                    ln1_g_ref[...], ln1_b_ref[...])                # (1, H) f32

    # FFN + LN2 on the CLS row only.
    f = jnp.dot(h1.astype(jnp.bfloat16), wf1t_ref[...],
                preferred_element_type=jnp.float32) + bf1_ref[...]
    f = jnp.maximum(f, 0.0)
    f = jnp.dot(f.astype(jnp.bfloat16), wf2t_ref[...],
                preferred_element_type=jnp.float32) + bf2_ref[...]
    h2 = _layernorm(h1 + f, ln2_g_ref[...], ln2_b_ref[...])        # (1, H) f32

    # --- fused MoE gate: linear -> softmax top-1 weight & index -------------
    glog = jnp.dot(h2.astype(jnp.bfloat16), wgt_ref[...],
                   preferred_element_type=jnp.float32) + bg_ref[...]   # (1, E)
    gmax = jnp.max(glog, axis=-1, keepdims=True)
    # top-1 softmax value == 1 / sum(exp(logits - max)); EXACT reciprocal here
    # because it multiplicatively scales the final classifier logits.
    topw = 1.0 / jnp.sum(jnp.exp(glog - gmax), axis=-1, keepdims=True)
    # argmax of the logits (first-max tie-break), matching torch.topk.
    ids = jax.lax.broadcasted_iota(jnp.int32, glog.shape, 1)
    topi = jnp.min(jnp.where(glog == gmax, ids, num_experts),
                   axis=-1, keepdims=True)

    cls_ref[0] = h2.astype(cls_ref.dtype)          # (1, H) bf16 intermediate
    topw_ref[0] = topw
    topi_ref[0] = topi.astype(jnp.int32)


def encoder_gate_forward(x_emb_bf16, negmask, p):
    B, S, H = x_emb_bf16.shape
    E = p["bg"].shape[-1]
    kernel = functools.partial(encoder_gate_kernel, num_experts=E)

    weight_names = ["wqt", "bq", "wkt", "bk", "wvt", "bv", "wot", "bo",
                    "ln1_g", "ln1_b", "wf1t", "bf1", "wf2t", "bf2",
                    "ln2_g", "ln2_b", "wgt", "bg"]
    in_specs = [pl.BlockSpec((1, S, H), lambda b: (b, 0, 0)),      # activations stream
                pl.BlockSpec((1, 1, S), lambda b: (b, 0, 0))]      # key mask
    in_specs += [_resident_spec(p[n]) for n in weight_names]       # weights resident

    return pl.pallas_call(
        kernel,
        grid=(B,),
        in_specs=in_specs,
        out_specs=(pl.BlockSpec((1, 1, H), lambda b: (b, 0, 0)),
                   pl.BlockSpec((1, 1, 1), lambda b: (b, 0, 0)),
                   pl.BlockSpec((1, 1, 1), lambda b: (b, 0, 0))),
        out_shape=(jax.ShapeDtypeStruct((B, 1, H), jnp.bfloat16),   # CLS hidden
                   jax.ShapeDtypeStruct((B, 1, 1), jnp.float32),    # top-1 gate weight
                   jax.ShapeDtypeStruct((B, 1, 1), jnp.int32)),     # top-1 expert idx
        compiler_params=pltpu.CompilerParams(
            dimension_semantics=("parallel",),
            vmem_limit_bytes=32 * 1024 * 1024),
    )(x_emb_bf16, negmask, *[p[n] for n in weight_names])


# ----------------------------------------------------------------------------
# Kernel 2: selected LoRA expert (low-rank path) + classifier.
# The expert index chosen by batch row 0 is scalar-prefetched and used in the
# BlockSpec index_maps, so only ONE expert's weights are DMA'd into VMEM.
# ----------------------------------------------------------------------------
def expert_head_kernel(idx_ref, x_ref, topw_ref,
                       w1t_ref, b1_ref, a1t_ref, B1t_ref,
                       w2t_ref, b2_ref, a2t_ref, B2t_ref,
                       wct_ref, bc_ref, logits_ref):
    del idx_ref  # consumed only by the BlockSpec index_maps (expert selection)
    xb = x_ref[...]                                 # (B, H) bf16 CLS tokens
    topw = topw_ref[...]                            # (B, 1) f32 per-row gate weight

    # ---- first LoRA linear:  x @ W1^T + (x @ B1^T) @ A1^T + b1 ----
    w1, b1 = w1t_ref[0], b1_ref[0]                  # (H, Hm) bf16, (1, Hm) f32
    a1, lb1 = a1t_ref[0], B1t_ref[0]                # (r, Hm), (H, r) bf16
    h = (jnp.dot(xb, w1, preferred_element_type=jnp.float32)
         + jnp.dot(jnp.dot(xb, lb1,
                           preferred_element_type=jnp.float32).astype(jnp.bfloat16),
                   a1, preferred_element_type=jnp.float32)
         + b1)
    h = jnp.maximum(h, 0.0)                         # ReLU
    hb = h.astype(jnp.bfloat16)

    # ---- second LoRA linear: h @ W2^T + (h @ B2^T) @ A2^T + b2 ----
    w2, b2 = w2t_ref[0], b2_ref[0]                  # (Hm, H) bf16, (1, H) f32
    a2, lb2 = a2t_ref[0], B2t_ref[0]                # (r, H), (Hm, r) bf16
    y = (jnp.dot(hb, w2, preferred_element_type=jnp.float32)
         + jnp.dot(jnp.dot(hb, lb2,
                           preferred_element_type=jnp.float32).astype(jnp.bfloat16),
                   a2, preferred_element_type=jnp.float32)
         + b2)

    moe_out = (y * topw).astype(jnp.bfloat16)       # per-row gate scaling
    logits_ref[...] = jnp.dot(moe_out, wct_ref[...],
                              preferred_element_type=jnp.float32) + bc_ref[...]


def expert_head(cls_bf16, topw, idx0, p):
    B, H = cls_bf16.shape
    C = p["bc"].shape[-1]

    def sel_spec(arr):   # pick ONE expert slice via the scalar-prefetched index
        return pl.BlockSpec((1,) + tuple(arr.shape[1:]),
                            lambda i, idx: (idx[0], 0, 0))

    def const_spec(shape):
        return pl.BlockSpec(shape, lambda i, idx: (0,) * len(shape))

    grid_spec = pltpu.PrefetchScalarGridSpec(
        num_scalar_prefetch=1,
        grid=(1,),
        in_specs=[const_spec((B, H)),                # cls tokens
                  const_spec((B, 1)),                # top-1 gate weights
                  sel_spec(p["w1t"]), sel_spec(p["b1"]),
                  sel_spec(p["a1t"]), sel_spec(p["B1t"]),
                  sel_spec(p["w2t"]), sel_spec(p["b2"]),
                  sel_spec(p["a2t"]), sel_spec(p["B2t"]),
                  const_spec(p["wct"].shape), const_spec(p["bc"].shape)],
        out_specs=pl.BlockSpec((B, C), lambda i, idx: (0, 0)),
    )
    return pl.pallas_call(
        expert_head_kernel,
        grid_spec=grid_spec,
        out_shape=jax.ShapeDtypeStruct((B, C), jnp.float32),
        compiler_params=pltpu.CompilerParams(
            dimension_semantics=("arbitrary",),
            vmem_limit_bytes=32 * 1024 * 1024),
    )(idx0, cls_bf16, topw,
      p["w1t"], p["b1"], p["a1t"], p["B1t"],
      p["w2t"], p["b2"], p["a2t"], p["B2t"],
      p["wct"], p["bc"])


# ----------------------------------------------------------------------------
# Parameter init (deterministic; weights stored PRE-TRANSPOSED, matmul
# operands in bf16, biases / layernorm params in f32)
# ----------------------------------------------------------------------------
def init_params(key, V, S, H, F, Hm, E, r, C):
    ks = iter(jax.random.split(key, 32))

    def nrm(shape, s=0.01):
        return (jax.random.normal(next(ks), shape) * s).astype(jnp.float32)

    bf16, f32 = jnp.bfloat16, jnp.float32
    p = {}
    # ---- encoder stand-in ----
    p["tok_emb"] = nrm((V, H), 0.02)
    p["pos_emb"] = nrm((S, H), 0.02)
    p["wqt"] = nrm((H, H), 0.02).T.astype(bf16); p["bq"] = jnp.zeros((1, H), f32)
    p["wkt"] = nrm((H, H), 0.02).T.astype(bf16); p["bk"] = jnp.zeros((1, H), f32)
    p["wvt"] = nrm((H, H), 0.02).T.astype(bf16); p["bv"] = jnp.zeros((1, H), f32)
    p["wot"] = nrm((H, H), 0.02).T.astype(bf16); p["bo"] = jnp.zeros((1, H), f32)
    p["ln1_g"], p["ln1_b"] = jnp.ones((1, H), f32), jnp.zeros((1, H), f32)
    p["wf1t"] = nrm((F, H), 0.02).T.astype(bf16); p["bf1"] = jnp.zeros((1, F), f32)
    p["wf2t"] = nrm((H, F), 0.02).T.astype(bf16); p["bf2"] = jnp.zeros((1, H), f32)
    p["ln2_g"], p["ln2_b"] = jnp.ones((1, H), f32), jnp.zeros((1, H), f32)
    # ---- MoE gate (nn.Linear(H, E)), stored as (H, E) ----
    p["wgt"] = nrm((E, H), 0.02).T.astype(bf16); p["bg"] = jnp.zeros((1, E), f32)
    # ---- experts (LoRALinear), stacked over E, stored transposed ----
    p["w1t"] = jnp.transpose(nrm((E, Hm, H)), (0, 2, 1)).astype(bf16)   # (E, H, Hm)
    p["b1"] = jnp.zeros((E, 1, Hm), f32)
    p["a1t"] = jnp.transpose(nrm((E, Hm, r)), (0, 2, 1)).astype(bf16)   # (E, r, Hm)
    p["B1t"] = jnp.transpose(nrm((E, r, H)), (0, 2, 1)).astype(bf16)    # (E, H, r)
    p["w2t"] = jnp.transpose(nrm((E, H, Hm)), (0, 2, 1)).astype(bf16)   # (E, Hm, H)
    p["b2"] = jnp.zeros((E, 1, H), f32)
    p["a2t"] = jnp.transpose(nrm((E, H, r)), (0, 2, 1)).astype(bf16)    # (E, r, H)
    p["B2t"] = jnp.transpose(nrm((E, r, Hm)), (0, 2, 1)).astype(bf16)   # (E, Hm, r)
    # ---- classifier (nn.Linear(H, C)), stored as (H, C) ----
    p["wct"] = nrm((C, H), 0.02).T.astype(bf16); p["bc"] = jnp.zeros((1, C), f32)
    return p


# ----------------------------------------------------------------------------
# Full forward: (input_ids, attention_mask) -> (logits, expert_ids)
# ----------------------------------------------------------------------------
def lmfed_moe_forward(params, input_ids, attention_mask):
    B, S = input_ids.shape
    # TODO(synk): token-embedding gather kept as XLA glue (tiny here); could be
    #             folded into the encoder kernel via a scalar-prefetched id
    #             row-gather BlockSpec at realistic vocab sizes.
    emb = (jnp.take(params["tok_emb"], input_ids, axis=0)
           + params["pos_emb"][None]).astype(jnp.bfloat16)          # bf16 stream
    negmask = ((1.0 - attention_mask.astype(jnp.float32)) * (-1e9)).reshape(B, 1, S)

    cls3, topw3, topi3 = encoder_gate_forward(emb, negmask, params)
    cls = cls3.reshape(B, -1)                    # (B, H) bf16
    topw = topw3.reshape(B, 1)                   # (B, 1) f32
    expert_ids = topi3.reshape(B, 1)             # (B, 1) int32

    # PyTorch quirk: the expert chosen by batch row 0 is applied to ALL rows.
    idx0 = expert_ids[0]                         # (1,) int32 -> scalar prefetch
    logits = expert_head(cls, topw, idx0, params)
    return logits, expert_ids


# ----------------------------------------------------------------------------
if __name__ == "__main__":
    B, S, H = 2, 8, 32          # batch, seq, encoder hidden
    V, F = 100, 64              # vocab, encoder FFN dim
    Hm, E, r, C = 64, 4, 4, 2   # moe_hidden_dim, num_experts, lora_rank, classes

    key = jax.random.PRNGKey(0)
    k_params, k_ids = jax.random.split(key)
    params = init_params(k_params, V, S, H, F, Hm, E, r, C)

    input_ids = jax.random.randint(k_ids, (B, S), 0, V, dtype=jnp.int32)
    attention_mask = jnp.ones((B, S), dtype=jnp.int32).at[1, -2:].set(0)  # padding

    logits, expert_ids = lmfed_moe_forward(params, input_ids, attention_mask)
    jax.block_until_ready((logits, expert_ids))

    assert logits.shape == (B, C) and expert_ids.shape == (B, 1)
    print("KERNEL_OK")
</pallas_src>

<mosaic_0001>
module attributes {stable_mosaic.version = 11 : i64} {
  func.func @encoder_gate_kernel(%arg0: i32, %arg1: memref<1x8x32xbf16, #tpu.memory_space<vmem>>, %arg2: memref<1x1x8xf32, #tpu.memory_space<vmem>>, %arg3: memref<32x32xbf16, #tpu.memory_space<vmem>>, %arg4: memref<1x32xf32, #tpu.memory_space<vmem>>, %arg5: memref<32x32xbf16, #tpu.memory_space<vmem>>, %arg6: memref<1x32xf32, #tpu.memory_space<vmem>>, %arg7: memref<32x32xbf16, #tpu.memory_space<vmem>>, %arg8: memref<1x32xf32, #tpu.memory_space<vmem>>, %arg9: memref<32x32xbf16, #tpu.memory_space<vmem>>, %arg10: memref<1x32xf32, #tpu.memory_space<vmem>>, %arg11: memref<1x32xf32, #tpu.memory_space<vmem>>, %arg12: memref<1x32xf32, #tpu.memory_space<vmem>>, %arg13: memref<32x64xbf16, #tpu.memory_space<vmem>>, %arg14: memref<1x64xf32, #tpu.memory_space<vmem>>, %arg15: memref<64x32xbf16, #tpu.memory_space<vmem>>, %arg16: memref<1x32xf32, #tpu.memory_space<vmem>>, %arg17: memref<1x32xf32, #tpu.memory_space<vmem>>, %arg18: memref<1x32xf32, #tpu.memory_space<vmem>>, %arg19: memref<32x4xbf16, #tpu.memory_space<vmem>>, %arg20: memref<1x4xf32, #tpu.memory_space<vmem>>, %arg21: memref<1x1x32xbf16, #tpu.memory_space<vmem>>, %arg22: memref<1x1x1xf32, #tpu.memory_space<vmem>>, %arg23: memref<1x1x1xi32, #tpu.memory_space<vmem>>) attributes {dimension_semantics = [#tpu.dimension_semantics<parallel>], iteration_bounds = array<i64: 2>, scalar_prefetch = 0 : i64, scratch_operands = 0 : i64, tpu.core_type = #tpu.core_type<tc>, window_params = [{transform_indices = @transform_0, window_bounds = array<i64: 1, 8, 32>}, {transform_indices = @transform_1, window_bounds = array<i64: 1, 1, 8>}, {pipeline_mode = #tpu.pipeline_mode<synchronous>, transform_indices = @transform_2, window_bounds = array<i64: 32, 32>}, {pipeline_mode = #tpu.pipeline_mode<synchronous>, transform_indices = @transform_3, window_bounds = array<i64: 1, 32>}, {pipeline_mode = #tpu.pipeline_mode<synchronous>, transform_indices = @transform_4, window_bounds = array<i64: 32, 32>}, {pipeline_mode = #tpu.pipeline_mode<synchronous>, transform_indices = @transform_5, window_bounds = array<i64: 1, 32>}, {pipeline_mode = #tpu.pipeline_mode<synchronous>, transform_indices = @transform_6, window_bounds = array<i64: 32, 32>}, {pipeline_mode = #tpu.pipeline_mode<synchronous>, transform_indices = @transform_7, window_bounds = array<i64: 1, 32>}, {pipeline_mode = #tpu.pipeline_mode<synchronous>, transform_indices = @transform_8, window_bounds = array<i64: 32, 32>}, {pipeline_mode = #tpu.pipeline_mode<synchronous>, transform_indices = @transform_9, window_bounds = array<i64: 1, 32>}, {pipeline_mode = #tpu.pipeline_mode<synchronous>, transform_indices = @transform_10, window_bounds = array<i64: 1, 32>}, {pipeline_mode = #tpu.pipeline_mode<synchronous>, transform_indices = @transform_11, window_bounds = array<i64: 1, 32>}, {pipeline_mode = #tpu.pipeline_mode<synchronous>, transform_indices = @transform_12, window_bounds = array<i64: 32, 64>}, {pipeline_mode = #tpu.pipeline_mode<synchronous>, transform_indices = @transform_13, window_bounds = array<i64: 1, 64>}, {pipeline_mode = #tpu.pipeline_mode<synchronous>, transform_indices = @transform_14, window_bounds = array<i64: 64, 32>}, {pipeline_mode = #tpu.pipeline_mode<synchronous>, transform_indices = @transform_15, window_bounds = array<i64: 1, 32>}, {pipeline_mode = #tpu.pipeline_mode<synchronous>, transform_indices = @transform_16, window_bounds = array<i64: 1, 32>}, {pipeline_mode = #tpu.pipeline_mode<synchronous>, transform_indices = @transform_17, window_bounds = array<i64: 1, 32>}, {pipeline_mode = #tpu.pipeline_mode<synchronous>, transform_indices = @transform_18, window_bounds = array<i64: 32, 4>}, {pipeline_mode = #tpu.pipeline_mode<synchronous>, transform_indices = @transform_19, window_bounds = array<i64: 1, 4>}, {transform_indices = @transform_20, window_bounds = array<i64: 1, 1, 32>}, {transform_indices = @transform_21, window_bounds = array<i64: 1, 1, 1>}, {transform_indices = @transform_22, window_bounds = array<i64: 1, 1, 1>}]} {
    %c0 = arith.constant 0 : index
    %c0_0 = arith.constant 0 : index
    %c0_1 = arith.constant 0 : index
    %0 = vector.load %arg1[%c0, %c0_0, %c0_1] : memref<1x8x32xbf16, #tpu.memory_space<vmem>>, vector<1x8x32xbf16>
    %1 = vector.shape_cast %0 : vector<1x8x32xbf16> to vector<8x32xbf16>
    %2 = vector.extract_strided_slice %1 {offsets = [0, 0], sizes = [1, 32], strides = [1, 1]} : vector<8x32xbf16> to vector<1x32xbf16>
    %c0_2 = arith.constant 0 : index
    %c0_3 = arith.constant 0 : index
    %3 = vector.load %arg5[%c0_2, %c0_3] : memref<32x32xbf16, #tpu.memory_space<vmem>>, vector<32x32xbf16>
    %cst = arith.constant dense<0.000000e+00> : vector<8x32xf32>
    %4 = tpu.matmul %1, %3, %cst {dimension_numbers = #tpu.dot_dimension_numbers<[1], [0], [0], [1], [0, 0, 1, 1], [], []>} : vector<8x32xbf16>, vector<32x32xbf16>, vector<8x32xf32> -> vector<8x32xf32>
    %c0_4 = arith.constant 0 : index
    %c0_5 = arith.constant 0 : index
    %5 = vector.load %arg6[%c0_4, %c0_5] : memref<1x32xf32, #tpu.memory_space<vmem>>, vector<1x32xf32>
    %6 = vector.broadcast %5 : vector<1x32xf32> to vector<8x32xf32>
    %7 = arith.addf %4, %6 : vector<8x32xf32>
    %c0_6 = arith.constant 0 : index
    %c0_7 = arith.constant 0 : index
    %8 = vector.load %arg7[%c0_6, %c0_7] : memref<32x32xbf16, #tpu.memory_space<vmem>>, vector<32x32xbf16>
    %cst_8 = arith.constant dense<0.000000e+00> : vector<8x32xf32>
    %9 = tpu.matmul %1, %8, %cst_8 {dimension_numbers = #tpu.dot_dimension_numbers<[1], [0], [0], [1], [0, 0, 1, 1], [], []>} : vector<8x32xbf16>, vector<32x32xbf16>, vector<8x32xf32> -> vector<8x32xf32>
    %c0_9 = arith.constant 0 : index
    %c0_10 = arith.constant 0 : index
    %10 = vector.load %arg8[%c0_9, %c0_10] : memref<1x32xf32, #tpu.memory_space<vmem>>, vector<1x32xf32>
    %11 = vector.broadcast %10 : vector<1x32xf32> to vector<8x32xf32>
    %12 = arith.addf %9, %11 : vector<8x32xf32>
    %c0_11 = arith.constant 0 : index
    %c0_12 = arith.constant 0 : index
    %13 = vector.load %arg3[%c0_11, %c0_12] : memref<32x32xbf16, #tpu.memory_space<vmem>>, vector<32x32xbf16>
    %cst_13 = arith.constant dense<0.000000e+00> : vector<1x32xf32>
    %14 = tpu.matmul %2, %13, %cst_13 {dimension_numbers = #tpu.dot_dimension_numbers<[1], [0], [0], [1], [0, 0, 1, 1], [], []>} : vector<1x32xbf16>, vector<32x32xbf16>, vector<1x32xf32> -> vector<1x32xf32>
    %c0_14 = arith.constant 0 : index
    %c0_15 = arith.constant 0 : index
    %15 = vector.load %arg4[%c0_14, %c0_15] : memref<1x32xf32, #tpu.memory_space<vmem>>, vector<1x32xf32>
    %16 = arith.addf %14, %15 : vector<1x32xf32>
    %cst_16 = arith.constant 0.176776692 : f32
    %17 = vector.broadcast %cst_16 : f32 to vector<1x32xf32>
    %18 = arith.mulf %16, %17 : vector<1x32xf32>
    %19 = arith.truncf %18 : vector<1x32xf32> to vector<1x32xbf16>
    %20 = arith.truncf %7 : vector<8x32xf32> to vector<8x32xbf16>
    "tpu.trace_start"() <{level = 10 : i32, message = "qh,kh->qk"}> : () -> ()
    %cst_17 = arith.constant dense<0.000000e+00> : vector<1x8xf32>
    %21 = tpu.matmul %19, %20, %cst_17 {dimension_numbers = #tpu.dot_dimension_numbers<[1], [1], [0], [0], [0, 0, 1, 0], [], []>} : vector<1x32xbf16>, vector<8x32xbf16>, vector<1x8xf32> -> vector<1x8xf32>
    "tpu.trace_stop"() : () -> ()
    %c0_18 = arith.constant 0 : index
    %c0_19 = arith.constant 0 : index
    %c0_20 = arith.constant 0 : index
    %22 = vector.load %arg2[%c0_18, %c0_19, %c0_20] : memref<1x1x8xf32, #tpu.memory_space<vmem>>, vector<1x1x8xf32>
    %23 = vector.shape_cast %22 : vector<1x1x8xf32> to vector<1x8xf32>
    %24 = arith.addf %21, %23 : vector<1x8xf32>
    %cst_21 = arith.constant dense<0xFF800000> : vector<1xf32>
    %25 = vector.multi_reduction <maximumf>, %24, %cst_21 [1] : vector<1x8xf32> to vector<1xf32>
    %26 = vector.shape_cast %25 : vector<1xf32> to vector<1x1xf32>
    %27 = vector.broadcast %26 : vector<1x1xf32> to vector<1x8xf32>
    %28 = arith.subf %24, %27 : vector<1x8xf32>
    %29 = math.exp %28 : vector<1x8xf32>
    %cst_22 = arith.constant dense<0.000000e+00> : vector<1xf32>
    %30 = vector.multi_reduction <add>, %29, %cst_22 [1] : vector<1x8xf32> to vector<1xf32>
    %31 = vector.shape_cast %30 : vector<1xf32> to vector<1x1xf32>
    %32 = tpu.reciprocal %31 {approx = true} : vector<1x1xf32> -> vector<1x1xf32>
    %33 = vector.broadcast %32 : vector<1x1xf32> to vector<1x8xf32>
    %34 = arith.mulf %29, %33 : vector<1x8xf32>
    %35 = arith.truncf %34 : vector<1x8xf32> to vector<1x8xbf16>
    %36 = arith.truncf %12 : vector<8x32xf32> to vector<8x32xbf16>
    %cst_23 = arith.constant dense<0.000000e+00> : vector<1x32xf32>
    %37 = tpu.matmul %35, %36, %cst_23 {dimension_numbers = #tpu.dot_dimension_numbers<[1], [0], [0], [1], [0, 0, 1, 1], [], []>} : vector<1x8xbf16>, vector<8x32xbf16>, vector<1x32xf32> -> vector<1x32xf32>
    %38 = arith.truncf %37 : vector<1x32xf32> to vector<1x32xbf16>
    %c0_24 = arith.constant 0 : index
    %c0_25 = arith.constant 0 : index
    %39 = vector.load %arg9[%c0_24, %c0_25] : memref<32x32xbf16, #tpu.memory_space<vmem>>, vector<32x32xbf16>
    %cst_26 = arith.constant dense<0.000000e+00> : vector<1x32xf32>
    %40 = tpu.matmul %38, %39, %cst_26 {dimension_numbers = #tpu.dot_dimension_numbers<[1], [0], [0], [1], [0, 0, 1, 1], [], []>} : vector<1x32xbf16>, vector<32x32xbf16>, vector<1x32xf32> -> vector<1x32xf32>
    %c0_27 = arith.constant 0 : index
    %c0_28 = arith.constant 0 : index
    %41 = vector.load %arg10[%c0_27, %c0_28] : memref<1x32xf32, #tpu.memory_space<vmem>>, vector<1x32xf32>
    %42 = arith.addf %40, %41 : vector<1x32xf32>
    %43 = arith.extf %2 : vector<1x32xbf16> to vector<1x32xf32>
    %44 = arith.addf %43, %42 : vector<1x32xf32>
    %c0_29 = arith.constant 0 : index
    %c0_30 = arith.constant 0 : index
    %45 = vector.load %arg11[%c0_29, %c0_30] : memref<1x32xf32, #tpu.memory_space<vmem>>, vector<1x32xf32>
    %c0_31 = arith.constant 0 : index
    %c0_32 = arith.constant 0 : index
    %46 = vector.load %arg12[%c0_31, %c0_32] : memref<1x32xf32, #tpu.memory_space<vmem>>, vector<1x32xf32>
    %cst_33 = arith.constant dense<0.000000e+00> : vector<1xf32>
    %47 = vector.multi_reduction <add>, %44, %cst_33 [1] : vector<1x32xf32> to vector<1xf32>
    %48 = vector.shape_cast %47 : vector<1xf32> to vector<1x1xf32>
    %cst_34 = arith.constant 3.200000e+01 : f32
    %49 = vector.broadcast %cst_34 : f32 to vector<1x1xf32>
    %50 = arith.divf %48, %49 : vector<1x1xf32>
    %51 = vector.broadcast %50 : vector<1x1xf32> to vector<1x32xf32>
    %52 = arith.subf %44, %51 : vector<1x32xf32>
    %53 = arith.mulf %52, %52 : vector<1x32xf32>
    %cst_35 = arith.constant dense<0.000000e+00> : vector<1xf32>
    %54 = vector.multi_reduction <add>, %53, %cst_35 [1] : vector<1x32xf32> to vector<1xf32>
    %55 = vector.shape_cast %54 : vector<1xf32> to vector<1x1xf32>
    %cst_36 = arith.constant 3.200000e+01 : f32
    %56 = vector.broadcast %cst_36 : f32 to vector<1x1xf32>
    %57 = arith.divf %55, %56 : vector<1x1xf32>
    %58 = vector.broadcast %50 : vector<1x1xf32> to vector<1x32xf32>
    %59 = arith.subf %44, %58 : vector<1x32xf32>
    %cst_37 = arith.constant 9.99999974E-6 : f32
    %60 = vector.broadcast %cst_37 : f32 to vector<1x1xf32>
    %61 = arith.addf %57, %60 : vector<1x1xf32>
    %62 = math.rsqrt %61 : vector<1x1xf32>
    %63 = vector.broadcast %62 : vector<1x1xf32> to vector<1x32xf32>
    %64 = arith.mulf %59, %63 : vector<1x32xf32>
    %65 = arith.mulf %64, %45 : vector<1x32xf32>
    %66 = arith.addf %65, %46 : vector<1x32xf32>
    %67 = arith.truncf %66 : vector<1x32xf32> to vector<1x32xbf16>
    %c0_38 = arith.constant 0 : index
    %c0_39 = arith.constant 0 : index
    %68 = vector.load %arg13[%c0_38, %c0_39] : memref<32x64xbf16, #tpu.memory_space<vmem>>, vector<32x64xbf16>
    %cst_40 = arith.constant dense<0.000000e+00> : vector<1x64xf32>
    %69 = tpu.matmul %67, %68, %cst_40 {dimension_numbers = #tpu.dot_dimension_numbers<[1], [0], [0], [1], [0, 0, 1, 1], [], []>} : vector<1x32xbf16>, vector<32x64xbf16>, vector<1x64xf32> -> vector<1x64xf32>
    %c0_41 = arith.constant 0 : index
    %c0_42 = arith.constant 0 : index
    %70 = vector.load %arg14[%c0_41, %c0_42] : memref<1x64xf32, #tpu.memory_space<vmem>>, vector<1x64xf32>
    %71 = arith.addf %69, %70 : vector<1x64xf32>
    %cst_43 = arith.constant 0.000000e+00 : f32
    %72 = vector.broadcast %cst_43 : f32 to vector<1x64xf32>
    %73 = arith.maximumf %71, %72 : vector<1x64xf32>
    %74 = arith.truncf %73 : vector<1x64xf32> to vector<1x64xbf16>
    %c0_44 = arith.constant 0 : index
    %c0_45 = arith.constant 0 : index
    %75 = vector.load %arg15[%c0_44, %c0_45] : memref<64x32xbf16, #tpu.memory_space<vmem>>, vector<64x32xbf16>
    %cst_46 = arith.constant dense<0.000000e+00> : vector<1x32xf32>
    %76 = tpu.matmul %74, %75, %cst_46 {dimension_numbers = #tpu.dot_dimension_numbers<[1], [0], [0], [1], [0, 0, 1, 1], [], []>} : vector<1x64xbf16>, vector<64x32xbf16>, vector<1x32xf32> -> vector<1x32xf32>
    %c0_47 = arith.constant 0 : index
    %c0_48 = arith.constant 0 : index
    %77 = vector.load %arg16[%c0_47, %c0_48] : memref<1x32xf32, #tpu.memory_space<vmem>>, vector<1x32xf32>
    %78 = arith.addf %76, %77 : vector<1x32xf32>
    %79 = arith.addf %66, %78 : vector<1x32xf32>
    %c0_49 = arith.constant 0 : index
    %c0_50 = arith.constant 0 : index
    %80 = vector.load %arg17[%c0_49, %c0_50] : memref<1x32xf32, #tpu.memory_space<vmem>>, vector<1x32xf32>
    %c0_51 = arith.constant 0 : index
    %c0_52 = arith.constant 0 : index
    %81 = vector.load %arg18[%c0_51, %c0_52] : memref<1x32xf32, #tpu.memory_space<vmem>>, vector<1x32xf32>
    %cst_53 = arith.constant dense<0.000000e+00> : vector<1xf32>
    %82 = vector.multi_reduction <add>, %79, %cst_53 [1] : vector<1x32xf32> to vector<1xf32>
    %83 = vector.shape_cast %82 : vector<1xf32> to vector<1x1xf32>
    %cst_54 = arith.constant 3.200000e+01 : f32
    %84 = vector.broadcast %cst_54 : f32 to vector<1x1xf32>
    %85 = arith.divf %83, %84 : vector<1x1xf32>
    %86 = vector.broadcast %85 : vector<1x1xf32> to vector<1x32xf32>
    %87 = arith.subf %79, %86 : vector<1x32xf32>
    %88 = arith.mulf %87, %87 : vector<1x32xf32>
    %cst_55 = arith.constant dense<0.000000e+00> : vector<1xf32>
    %89 = vector.multi_reduction <add>, %88, %cst_55 [1] : vector<1x32xf32> to vector<1xf32>
    %90 = vector.shape_cast %89 : vector<1xf32> to vector<1x1xf32>
    %cst_56 = arith.constant 3.200000e+01 : f32
    %91 = vector.broadcast %cst_56 : f32 to vector<1x1xf32>
    %92 = arith.divf %90, %91 : vector<1x1xf32>
    %93 = vector.broadcast %85 : vector<1x1xf32> to vector<1x32xf32>
    %94 = arith.subf %79, %93 : vector<1x32xf32>
    %cst_57 = arith.constant 9.99999974E-6 : f32
    %95 = vector.broadcast %cst_57 : f32 to vector<1x1xf32>
    %96 = arith.addf %92, %95 : vector<1x1xf32>
    %97 = math.rsqrt %96 : vector<1x1xf32>
    %98 = vector.broadcast %97 : vector<1x1xf32> to vector<1x32xf32>
    %99 = arith.mulf %94, %98 : vector<1x32xf32>
    %100 = arith.mulf %99, %80 : vector<1x32xf32>
    %101 = arith.addf %100, %81 : vector<1x32xf32>
    %102 = arith.truncf %101 : vector<1x32xf32> to vector<1x32xbf16>
    %c0_58 = arith.constant 0 : index
    %c0_59 = arith.constant 0 : index
    %103 = vector.load %arg19[%c0_58, %c0_59] : memref<32x4xbf16, #tpu.memory_space<vmem>>, vector<32x4xbf16>
    %cst_60 = arith.constant dense<0.000000e+00> : vector<1x4xf32>
    %104 = tpu.matmul %102, %103, %cst_60 {dimension_numbers = #tpu.dot_dimension_numbers<[1], [0], [0], [1], [0, 0, 1, 1], [], []>} : vector<1x32xbf16>, vector<32x4xbf16>, vector<1x4xf32> -> vector<1x4xf32>
    %c0_61 = arith.constant 0 : index
    %c0_62 = arith.constant 0 : index
    %105 = vector.load %arg20[%c0_61, %c0_62] : memref<1x4xf32, #tpu.memory_space<vmem>>, vector<1x4xf32>
    %106 = arith.addf %104, %105 : vector<1x4xf32>
    %cst_63 = arith.constant dense<0xFF800000> : vector<1xf32>
    %107 = vector.multi_reduction <maximumf>, %106, %cst_63 [1] : vector<1x4xf32> to vector<1xf32>
    %108 = vector.shape_cast %107 : vector<1xf32> to vector<1x1xf32>
    %109 = vector.broadcast %108 : vector<1x1xf32> to vector<1x4xf32>
    %110 = arith.subf %106, %109 : vector<1x4xf32>
    %111 = math.exp %110 : vector<1x4xf32>
    %cst_64 = arith.constant dense<0.000000e+00> : vector<1xf32>
    %112 = vector.multi_reduction <add>, %111, %cst_64 [1] : vector<1x4xf32> to vector<1xf32>
    %113 = vector.shape_cast %112 : vector<1xf32> to vector<1x1xf32>
    %cst_65 = arith.constant 1.000000e+00 : f32
    %114 = vector.broadcast %cst_65 : f32 to vector<1x1xf32>
    %115 = arith.divf %114, %113 : vector<1x1xf32>
    %116 = tpu.iota {dimensions = array<i32: 1>} : vector<1x4xi32>
    %117 = vector.broadcast %108 : vector<1x1xf32> to vector<1x4xf32>
    %118 = arith.cmpf oeq, %106, %117 : vector<1x4xf32>
    %c4_i32 = arith.constant 4 : i32
    %119 = vector.broadcast %c4_i32 : i32 to vector<1x4xi32>
    %120 = arith.select %118, %116, %119 : vector<1x4xi1>, vector<1x4xi32>
    %cst_66 = arith.constant dense<2147483647> : vector<1xi32>
    %121 = vector.multi_reduction <minsi>, %120, %cst_66 [1] : vector<1x4xi32> to vector<1xi32>
    %122 = vector.shape_cast %121 : vector<1xi32> to vector<1x1xi32>
    %123 = arith.truncf %101 : vector<1x32xf32> to vector<1x32xbf16>
    %c0_67 = arith.constant 0 : index
    %c0_68 = arith.constant 0 : index
    %c0_69 = arith.constant 0 : index
    %124 = vector.load %arg21[%c0_67, %c0_68, %c0_69] : memref<1x1x32xbf16, #tpu.memory_space<vmem>>, vector<1x1x32xbf16>
    %125 = vector.shape_cast %124 : vector<1x1x32xbf16> to vector<1x32xbf16>
    %126 = vector.shape_cast %123 : vector<1x32xbf16> to vector<1x1x32xbf16>
    tpu.vector_store %arg21[%c0_67, %c0_68, %c0_69], %126 {strides = array<i32>} : memref<1x1x32xbf16, #tpu.memory_space<vmem>>, vector<1x1x32xbf16>,
    %c0_70 = arith.constant 0 : index
    %c0_71 = arith.constant 0 : index
    %c0_72 = arith.constant 0 : index
    %127 = vector.load %arg22[%c0_70, %c0_71, %c0_72] : memref<1x1x1xf32, #tpu.memory_space<vmem>>, vector<1x1x1xf32>
    %128 = vector.shape_cast %127 : vector<1x1x1xf32> to vector<1x1xf32>
    %129 = vector.shape_cast %115 : vector<1x1xf32> to vector<1x1x1xf32>
    tpu.vector_store %arg22[%c0_70, %c0_71, %c0_72], %129 {strides = array<i32>} : memref<1x1x1xf32, #tpu.memory_space<vmem>>, vector<1x1x1xf32>,
    %c0_73 = arith.constant 0 : index
    %c0_74 = arith.constant 0 : index
    %c0_75 = arith.constant 0 : index
    %130 = vector.load %arg23[%c0_73, %c0_74, %c0_75] : memref<1x1x1xi32, #tpu.memory_space<vmem>>, vector<1x1x1xi32>
    %131 = vector.shape_cast %130 : vector<1x1x1xi32> to vector<1x1xi32>
    %132 = vector.shape_cast %122 : vector<1x1xi32> to vector<1x1x1xi32>
    tpu.vector_store %arg23[%c0_73, %c0_74, %c0_75], %132 {strides = array<i32>} : memref<1x1x1xi32, #tpu.memory_space<vmem>>, vector<1x1x1xi32>,
    return
  }
  func.func @transform_0(%arg0: i32) -> (i32, i32, i32) {
    %c0_i32 = arith.constant 0 : i32
    %c0_i32_0 = arith.constant 0 : i32
    %c0_i32_1 = arith.constant 0 : i32
    return %arg0, %c0_i32, %c0_i32_0 : i32, i32, i32
  }
  func.func @transform_1(%arg0: i32) -> (i32, i32, i32) {
    %c0_i32 = arith.constant 0 : i32
    %c0_i32_0 = arith.constant 0 : i32
    %c0_i32_1 = arith.constant 0 : i32
    return %arg0, %c0_i32, %c0_i32_0 : i32, i32, i32
  }
  func.func @transform_2(%arg0: i32) -> (i32, i32) {
    %c0_i32 = arith.constant 0 : i32
    %c0_i32_0 = arith.constant 0 : i32
    %c0_i32_1 = arith.constant 0 : i32
    return %c0_i32, %c0_i32_0 : i32, i32
  }
  func.func @transform_3(%arg0: i32) -> (i32, i32) {
    %c0_i32 = arith.constant 0 : i32
    %c0_i32_0 = arith.constant 0 : i32
    %c0_i32_1 = arith.constant 0 : i32
    return %c0_i32, %c0_i32_0 : i32, i32
  }
  func.func @transform_4(%arg0: i32) -> (i32, i32) {
    %c0_i32 = arith.constant 0 : i32
    %c0_i32_0 = arith.constant 0 : i32
    %c0_i32_1 = arith.constant 0 : i32
    return %c0_i32, %c0_i32_0 : i32, i32
  }
  func.func @transform_5(%arg0: i32) -> (i32, i32) {
    %c0_i32 = arith.constant 0 : i32
    %c0_i32_0 = arith.constant 0 : i32
    %c0_i32_1 = arith.constant 0 : i32
    return %c0_i32, %c0_i32_0 : i32, i32
  }
  func.func @transform_6(%arg0: i32) -> (i32, i32) {
    %c0_i32 = arith.constant 0 : i32
    %c0_i32_0 = arith.constant 0 : i32
    %c0_i32_1 = arith.constant 0 : i32
    return %c0_i32, %c0_i32_0 : i32, i32
  }
  func.func @transform_7(%arg0: i32) -> (i32, i32) {
    %c0_i32 = arith.constant 0 : i32
    %c0_i32_0 = arith.constant 0 : i32
    %c0_i32_1 = arith.constant 0 : i32
    return %c0_i32, %c0_i32_0 : i32, i32
  }
  func.func @transform_8(%arg0: i32) -> (i32, i32) {
    %c0_i32 = arith.constant 0 : i32
    %c0_i32_0 = arith.constant 0 : i32
    %c0_i32_1 = arith.constant 0 : i32
    return %c0_i32, %c0_i32_0 : i32, i32
  }
  func.func @transform_9(%arg0: i32) -> (i32, i32) {
    %c0_i32 = arith.constant 0 : i32
    %c0_i32_0 = arith.constant 0 : i32
    %c0_i32_1 = arith.constant 0 : i32
    return %c0_i32, %c0_i32_0 : i32, i32
  }
  func.func @transform_10(%arg0: i32) -> (i32, i32) {
    %c0_i32 = arith.constant 0 : i32
    %c0_i32_0 = arith.constant 0 : i32
    %c0_i32_1 = arith.constant 0 : i32
    return %c0_i32, %c0_i32_0 : i32, i32
  }
  func.func @transform_11(%arg0: i32) -> (i32, i32) {
    %c0_i32 = arith.constant 0 : i32
    %c0_i32_0 = arith.constant 0 : i32
    %c0_i32_1 = arith.constant 0 : i32
    return %c0_i32, %c0_i32_0 : i32, i32
  }
  func.func @transform_12(%arg0: i32) -> (i32, i32) {
    %c0_i32 = arith.constant 0 : i32
    %c0_i32_0 = arith.constant 0 : i32
    %c0_i32_1 = arith.constant 0 : i32
    return %c0_i32, %c0_i32_0 : i32, i32
  }
  func.func @transform_13(%arg0: i32) -> (i32, i32) {
    %c0_i32 = arith.constant 0 : i32
    %c0_i32_0 = arith.constant 0 : i32
    %c0_i32_1 = arith.constant 0 : i32
    return %c0_i32, %c0_i32_0 : i32, i32
  }
  func.func @transform_14(%arg0: i32) -> (i32, i32) {
    %c0_i32 = arith.constant 0 : i32
    %c0_i32_0 = arith.constant 0 : i32
    %c0_i32_1 = arith.constant 0 : i32
    return %c0_i32, %c0_i32_0 : i32, i32
  }
  func.func @transform_15(%arg0: i32) -> (i32, i32) {
    %c0_i32 = arith.constant 0 : i32
    %c0_i32_0 = arith.constant 0 : i32
    %c0_i32_1 = arith.constant 0 : i32
    return %c0_i32, %c0_i32_0 : i32, i32
  }
  func.func @transform_16(%arg0: i32) -> (i32, i32) {
    %c0_i32 = arith.constant 0 : i32
    %c0_i32_0 = arith.constant 0 : i32
    %c0_i32_1 = arith.constant 0 : i32
    return %c0_i32, %c0_i32_0 : i32, i32
  }
  func.func @transform_17(%arg0: i32) -> (i32, i32) {
    %c0_i32 = arith.constant 0 : i32
    %c0_i32_0 = arith.constant 0 : i32
    %c0_i32_1 = arith.constant 0 : i32
    return %c0_i32, %c0_i32_0 : i32, i32
  }
  func.func @transform_18(%arg0: i32) -> (i32, i32) {
    %c0_i32 = arith.constant 0 : i32
    %c0_i32_0 = arith.constant 0 : i32
    %c0_i32_1 = arith.constant 0 : i32
    return %c0_i32, %c0_i32_0 : i32, i32
  }
  func.func @transform_19(%arg0: i32) -> (i32, i32) {
    %c0_i32 = arith.constant 0 : i32
    %c0_i32_0 = arith.constant 0 : i32
    %c0_i32_1 = arith.constant 0 : i32
    return %c0_i32, %c0_i32_0 : i32, i32
  }
  func.func @transform_20(%arg0: i32) -> (i32, i32, i32) {
    %c0_i32 = arith.constant 0 : i32
    %c0_i32_0 = arith.constant 0 : i32
    %c0_i32_1 = arith.constant 0 : i32
    return %arg0, %c0_i32, %c0_i32_0 : i32, i32, i32
  }
  func.func @transform_21(%arg0: i32) -> (i32, i32, i32) {
    %c0_i32 = arith.constant 0 : i32
    %c0_i32_0 = arith.constant 0 : i32
    %c0_i32_1 = arith.constant 0 : i32
    return %arg0, %c0_i32, %c0_i32_0 : i32, i32, i32
  }
  func.func @transform_22(%arg0: i32) -> (i32, i32, i32) {
    %c0_i32 = arith.constant 0 : i32
    %c0_i32_0 = arith.constant 0 : i32
    %c0_i32_1 = arith.constant 0 : i32
    return %arg0, %c0_i32, %c0_i32_0 : i32, i32, i32
  }
}

</mosaic_0001>

<bundles_post_ra>
// kernel: tpu_custom_call.1
= control target key start
LH: loop header
LB: loop body
LE: loop exit
PB: predicated region body
PF: predicated region fallthrough
CT: control target
= control target key end

     0   :  { %s2534_s0 = inlined_call_operand.hbm [shape: bf16[2,8,32], index: 0, kind: input, shape index: {}]   ;;  %s2535_s1 = inlined_call_operand.hbm [shape: f32[2,1,8], index: 1, kind: input, shape index: {}]   ;;  %s2536_s2 = inlined_call_operand.vmem [shape: bf16[32,32], index: 2, kind: input, shape index: {}]   ;;  %s2537_s3 = inlined_call_operand.hbm [shape: f32[1,32], index: 3, kind: input, shape index: {}]   ;;  %s2538_s4 = inlined_call_operand.vmem [shape: bf16[32,32], index: 4, kind: input, shape index: {}]   ;;  %s2539_s5 = inlined_call_operand.hbm [shape: f32[1,32], index: 5, kind: input, shape index: {}]   ;;  %s2540_s6 = inlined_call_operand.vmem [shape: bf16[32,32], index: 6, kind: input, shape index: {}]   ;;  %s2541_s7 = inlined_call_operand.hbm [shape: f32[1,32], index: 7, kind: input, shape index: {}]   ;;  %s2542_s8 = inlined_call_operand.vmem [shape: bf16[32,32], index: 8, kind: input, shape index: {}]   ;;  %s2543_s9 = inlined_call_operand.vmem [shape: f32[1,32], index: 9, kind: input, shape index: {}]   ;;  %s2544_s10 = inlined_call_operand.vmem [shape: f32[1,32], index: 10, kind: input, shape index: {}]   ;;  %s2545_s11 = inlined_call_operand.vmem [shape: f32[1,32], index: 11, kind: input, shape index: {}]   ;;  %s2546_s12 = inlined_call_operand.vmem [shape: bf16[32,64], index: 12, kind: input, shape index: {}]   ;;  %s2547_s13 = inlined_call_operand.vmem [shape: f32[1,64], index: 13, kind: input, shape index: {}]   ;;  %s2548_s14 = inlined_call_operand.vmem [shape: bf16[64,32], index: 14, kind: input, shape index: {}]   ;;  %s2549_s15 = inlined_call_operand.vmem [shape: f32[1,32], index: 15, kind: input, shape index: {}]   ;;  %s2550_s16 = inlined_call_operand.vmem [shape: f32[1,32], index: 16, kind: input, shape index: {}]   ;;  %s2551_s17 = inlined_call_operand.vmem [shape: f32[1,32], index: 17, kind: input, shape index: {}]   ;;  %s2552_s18 = inlined_call_operand.vmem [shape: bf16[32,4], index: 18, kind: input, shape index: {}]   ;;  %s2553_s19 = inlined_call_operand.vmem [shape: f32[1,4], index: 19, kind: input, shape index: {}]   ;;  %s2554_s20 = inlined_call_operand.vmem [shape: bf16[2,1,32], index: 20, kind: output, shape index: {0}]   ;;  %s2555_s21 = inlined_call_operand.vmem [shape: f32[2,1,1], index: 21, kind: output, shape index: {1}]   ;;  %s2556_s22 = inlined_call_operand.vmem [shape: s32[2,1,1], index: 22, kind: output, shape index: {2}]  }
   0x1   :  { %2571 = sst [smem:[#allocation14_spill]] %s2534_s0 }
   0x2   :  { %2572 = sst [smem:[#allocation15_spill]] %s2535_s1 }
   0x3   :  { %2573 = sst [smem:[#allocation16_spill]] %s2536_s2 }
   0x4   :  { %2574 = sst [smem:[#allocation17_spill]] %s2537_s3 }
   0x5   :  { %2575 = sst [smem:[#allocation18_spill]] %s2538_s4 }
   0x6   :  { %2576 = sst [smem:[#allocation19_spill]] %s2539_s5 }
   0x7   :  { %2577 = sst [smem:[#allocation20_spill]] %s2540_s6 }
   0x8   :  { %2578 = sst [smem:[#allocation21_spill]] %s2541_s7 }
   0x9   :  { %2579 = sst [smem:[#allocation22_spill]] %s2550_s16 }
   0xa   :  { %2580 = sst [smem:[#allocation23_spill]] %s2551_s17 }
   0xb   :  { %2581 = sst [smem:[#allocation24_spill]] %s2552_s18 }
   0xc   :  { %2582 = sst [smem:[#allocation25_spill]] %s2553_s19 }
   0xd   :  { %2583 = sst [smem:[#allocation26_spill]] %s2554_s20 }
   0xe   :  { %2584 = sst [smem:[#allocation27_spill]] %s2555_s21 }
   0xf   :  { %2585 = sst [smem:[#allocation28_spill]] %s2556_s22 }
  0x10   :  { %28 = vsyncpa [#allocation3], 0 }
  0x11   :  { %30 = vsyncpa [#allocation3 + $0x1], 0 }
  0x12   :  { %31 = vsyncpa [#allocation5], 0 }
  0x13   :  { %33 = vsyncpa [#allocation5 + $0x1], 0 }
  0x14   :  { %34 = vsyncpa [#allocation8], 0  ;;  %s2145_s3 = smov 0   ;;  %s2147_s28 = smov 0  }
  0x15   :  { %s2149_s29 = smov 0   ;;  %s2151_s30 = smov 0  }
  0x16 LB: > { %s2164_s4 = sadd.s32 4294967295, %s2021_s30   ;;  %p60_p0 = scmp.ne.s32.totalorder %s2013_s28, %s2009_s3  ;;  %s2021_s30 = sphi %s2151_s30, %s2617_s30   ;;  %s2017_s29 = sphi %s2149_s29, %s2616_s29   ;;  %s2013_s28 = sphi %s2147_s28, %s2615_s28   ;;  %s2009_s3 = sphi %s2145_s3, %s2614_s3  }
  0x17   : > { %p2564_p1 = scmp.eq.s32.totalorder %s2164_s4, 0  ;;  %p1585_p2 = scmp.ge.s32.totalorder %s2021_s30, 1 }
  0x18   : > { %p553_p3 = scmp.lt.s32.totalorder %s2021_s30, 3  ;;  %s2023_s1 = smov [#allocation6]  }
  0x19   : > { %p2172_p4 = por %p2564_p1, %p60_p0  ;;  %s569_s5 = sshll.u32 %s2023_s1, 4  ;;  %s570_s5 = int_to_ptr.vmem [resolvable:$true] %s569_s5 }
  0x1a   : > { %p2176_p5 = pnand %p1585_p2, %p553_p3  ;;  %s2024_s24 = smov [#allocation7]  }
  0x1b   : > { %s2586_s0 = scalar_select %p2172_p4, 1, 0 }
  0x1c   : > { %s2587_s23 = scalar_select %p2176_p5, 1, 0 }
  0x1d   : > { %p1742_p6 = pneg %p2176_p5  ;;  %s583_s6 = sshll.u32 %s2024_s24, 4  ;;  %s2188_s6 = int_to_ptr.vmem [resolvable:$true] %s583_s6 }
  0x1e   : > { %s2025_s26 = smov [#allocation9]   ;;  %s2589_s1 = sld [smem:[#allocation17_spill]] }
  0x1f   : > { %p2184_p7 = pnand %p1742_p6, %p2564_p1  ;;  %s597_s2 = sshll.u32 %s2025_s26, 4  ;;  %s2190_s2 = int_to_ptr.vmem [resolvable:$true] %s597_s2 }
  0x21   : > { %p2200_p9 = pneg %p2184_p7 }
  0x24   : > { %s1831_s22 = scalar_lea.hbm %s2589_s1, 16 }
  0x25   : > { %p1832_p8 = scmp.ne.s32.totalorder %s2589_s1, %s1831_s22  ;;  %p1838_p12 = scmp.lt.u32.totalorder %s1831_s22, %s2589_s1 }
  0x27   : > { %p1834_p10 = pnand %p2200_p9, %p1832_p8 }
  0x29   : > { %p1835_p11 = pneg %p1834_p10 }
  0x2b   : > { %p1840_p13 = pnand %p1838_p12, %p1835_p11 }
  0x2d   : > { %1843 = shalt.err (!%p1840_p13)
}
  0x2e   : > { %s1844_s27 = scalar_lea.vmem %s570_s5, 16  ;;  %s1851_s19 = scalar_lea.vmem %s570_s5, 32 }
  0x2f   : > { %p1845_p0 = scmp.ne.s32.totalorder %s570_s5, %s1844_s27  ;;  %p1852_p6 = scmp.lt.s32.totalorder %s570_s5, %s570_s5 }
  0x30   : > { %p1853_p1 = scmp.lt.s32.totalorder %s1851_s19, %s1844_s27 }
  0x31   : > { %p1847_p2 = pnand %p1845_p0, %p2200_p9 }
  0x32   : > { %p1854_p4 = por %p1853_p1, %p1852_p6 }
  0x33   : > { %p1848_p3 = pneg %p1847_p2 }
  0x35   : > { %p1855_p5 = pnand %p1854_p4, %p1848_p3 }
  0x37   : > { %1858 = shalt.err (!%p1855_p5)
}
  0x38   : > { %1745 = dma.hbm_to_vmem [thread:$0]  (!%p2184_p7), %s2589_s1, 16, %s570_s5, [#allocation5]  }
  0x39   : > { %s2591_s26 = sld [smem:[#allocation19_spill]] }
  0x3f   : > { %s1859_s17 = scalar_lea.hbm %s2591_s26, 16 }
  0x40   : > { %p1860_p8 = scmp.ne.s32.totalorder %s2591_s26, %s1859_s17  ;;  %p1866_p4 = scmp.lt.u32.totalorder %s1859_s17, %s2591_s26 }
  0x42   : > { %p1862_p10 = pnand %p1860_p8, %p2200_p9 }
  0x44   : > { %p1863_p1 = pneg %p1862_p10 }
  0x46   : > { %p1868_p5 = pnand %p1866_p4, %p1863_p1 }
  0x48   : > { %1871 = shalt.err (!%p1868_p5)
}
  0x49   : > { %s1872_s5 = scalar_lea.vmem %s2188_s6, 16  ;;  %s1879_s16 = scalar_lea.vmem %s2188_s6, 32 }
  0x4a   : > { %p1873_p11 = scmp.ne.s32.totalorder %s2188_s6, %s1872_s5  ;;  %p1880_p0 = scmp.lt.s32.totalorder %s2188_s6, %s2188_s6 }
  0x4b   : > { %p1881_p2 = scmp.lt.s32.totalorder %s1879_s16, %s1872_s5 }
  0x4c   : > { %p1875_p12 = pnand %p1873_p11, %p2200_p9 }
  0x4d   : > { %p1882_p3 = por %p1881_p2, %p1880_p0 }
  0x4e   : > { %p1876_p13 = pneg %p1875_p12 }
  0x50   : > { %p1883_p6 = pnand %p1882_p3, %p1876_p13 }
  0x52   : > { %1886 = shalt.err (!%p1883_p6)
}
  0x53   : > { %1748 = dma.hbm_to_vmem [thread:$0]  (!%p2184_p7), %s2591_s26, 16, %s2188_s6, [#allocation8]  }
  0x54   : > { %s2592_s7 = sld [smem:[#allocation21_spill]] }
  0x5a   : > { %s1887_s20 = scalar_lea.hbm %s2592_s7, 16 }
  0x5b   : > { %p1888_p8 = scmp.ne.s32.totalorder %s2592_s7, %s1887_s20  ;;  %p1894_p4 = scmp.lt.u32.totalorder %s1887_s20, %s2592_s7 }
  0x5d   : > { %p1890_p10 = pnand %p1888_p8, %p2200_p9 }
  0x5f   : > { %p1891_p1 = pneg %p1890_p10 }
  0x61   : > { %p1896_p5 = pnand %p1894_p4, %p1891_p1 }
  0x63   : > { %1899 = shalt.err (!%p1896_p5)
}
  0x64   : > { %s1900_s6 = scalar_lea.vmem %s2190_s2, 16  ;;  %s1907_s16 = scalar_lea.vmem %s2190_s2, 32 }
  0x65   : > { %p1901_p11 = scmp.ne.s32.totalorder %s2190_s2, %s1900_s6  ;;  %p1908_p0 = scmp.lt.s32.totalorder %s2190_s2, %s2190_s2 }
  0x66   : > { %p1909_p2 = scmp.lt.s32.totalorder %s1907_s16, %s1900_s6 }
  0x67   : > { %p1903_p12 = pnand %p1901_p11, %p2200_p9 }
  0x68   : > { %p1910_p3 = por %p1909_p2, %p1908_p0 }
  0x69   : > { %p1904_p13 = pneg %p1903_p12 }
  0x6b   : > { %p1911_p6 = pnand %p1910_p3, %p1904_p13 }
  0x6d   : > { %1914 = shalt.err (!%p1911_p6)
}
  0x6e   : > { %1751 = dma.hbm_to_vmem [thread:$0]  (!%p2184_p7), %s2592_s7, 16, %s2190_s2, [#allocation8]  }
  0x6f   : > { %s2265_s24 = sadd.s32 1, %s2021_s30   ;;  %s47_s25 = sadd.s32 1, %s2017_s29 }
  0x70   : > { %s44_s21 = ssub.s32 %s2021_s30, %s2265_s24  ;;  %p54_p8 = scmp.ne.s32.totalorder %s2017_s29, %s2013_s28 }
  0x71   : > { %p45_p9 = scmp.eq.s32.totalorder %s44_s21, 0  ;;  %p55_p10 = scmp.eq.s32.totalorder %s2021_s30, 0 }
  0x72   : > { %p1762_p1 = scmp.lt.s32.totalorder %s2021_s30, 2  ;;  %s2278_s20 = sand.u32 1, %s2017_s29  }
  0x73   : > { %s2275_s3 = scalar_select %p45_p9, %s2017_s29, %s47_s25  }
  0x74   : > { %p56_p4 = por %p55_p10, %p54_p8  ;;  %s1590_s22 = sshll.u32 %s2278_s20, 2 }
  0x75   : > { %s1591_s27 = sshll.u32 %s2021_s30, 6  ;;  %s2593_s5 = sld [smem:[#allocation14_spill]] }
  0x76   : > { %s648_s16 = scalar_lea.vmem [#allocation2], %s1590_s22  ;;  %p2289_p7 = pnand %p1762_p1, %p56_p4 }
  0x77   : > { %s655_s17 = sshll.u32 %s648_s16, 4  ;;  %s645_s25 = scalar_lea.sflag [#allocation3], %s2278_s20  ;;  %s2287_s17 = int_to_ptr.vmem [resolvable:$true] %s655_s17 }
  0x78   : > { %p1917_p11 = pneg %p2289_p7 }
  0x7b   : > { %s2285_s6 = scalar_lea.hbm %s2593_s5, %s1591_s27  ;;  %s1920_s2 = scalar_lea.hbm %s2593_s5, 128 }
  0x7c   : > { %s1915_s1 = scalar_lea.hbm %s2285_s6, 64  ;;  %p1921_p0 = scmp.lt.u32.totalorder %s2285_s6, %s2593_s5 }
  0x7d   : > { %p1916_p5 = scmp.ne.s32.totalorder %s2285_s6, %s1915_s1  ;;  %p1922_p2 = scmp.lt.u32.totalorder %s1920_s2, %s1915_s1 }
  0x7e   : > { %p1924_p6 = scmp.lt.u32.totalorder %s1915_s1, %s2285_s6 }
  0x7f   : > { %p1918_p12 = pnand %p1917_p11, %p1916_p5  ;;  %p1923_p3 = por %p1922_p2, %p1921_p0 }
  0x81   : > { %p1919_p13 = pneg %p1918_p12  ;;  %p1925_p9 = por %p1924_p6, %p1923_p3 }
  0x83   : > { %p1926_p8 = pnand %p1925_p9, %p1919_p13 }
  0x85   : > { %1929 = shalt.err (!%p1926_p8)
}
  0x86   : > { %s1930_s21 = scalar_lea.vmem %s2287_s17, 64  ;;  %s2026_s22 = smov [#allocation2]  }
  0x87   : > { %p1931_p10 = scmp.ne.s32.totalorder %s2287_s17, %s1930_s21  ;;  %s1935_s27 = sshll.u32 %s2026_s22, 4  ;;  %s1936_s27 = int_to_ptr.vmem [resolvable:$false] %s1935_s27 }
  0x88   : > { %s1937_s19 = scalar_lea.vmem %s1936_s27, 128  ;;  %p1938_p5 = scmp.lt.s32.totalorder %s2287_s17, %s1936_s27 }
  0x89   : > { %p1933_p1 = pnand %p1931_p10, %p1917_p11  ;;  %p1939_p12 = scmp.lt.s32.totalorder %s1937_s19, %s1930_s21 }
  0x8b   : > { %p1934_p4 = pneg %p1933_p1  ;;  %p1940_p0 = por %p1939_p12, %p1938_p5 }
  0x8d   : > { %p1941_p2 = pnand %p1940_p0, %p1934_p4 }
  0x8f   : > { %1944 = shalt.err (!%p1941_p2)
}
  0x90   : > { %1755 = dma.hbm_to_vmem [thread:$0]  (!%p2289_p7), %s2285_s6, 64, %s2287_s17, %s645_s25  }
  0x91   : > { %s1592_s1 = sshll.u32 %s2021_s30, 4  ;;  %s665_s2 = scalar_lea.vmem [#allocation4], %s2278_s20 }
  0x92   : > { %s672_s16 = sshll.u32 %s665_s2, 4  ;;  %s2595_s7 = sld [smem:[#allocation15_spill]]  ;;  %s673_s16 = int_to_ptr.vmem [resolvable:$true] %s672_s16 }
  0x93   : > { %s2596_s21 = sand.u32 1, %s2021_s30  }
  0x94   : > { %s663_s19 = scalar_lea.sflag [#allocation5], %s2596_s21 }
  0x98   : > { %s2325_s27 = scalar_lea.hbm %s2595_s7, %s1592_s1  ;;  %s1950_s17 = scalar_lea.hbm %s2595_s7, 32 }
  0x99   : > { %s1945_s26 = scalar_lea.hbm %s2325_s27, 16  ;;  %p1951_p9 = scmp.lt.u32.totalorder %s2325_s27, %s2595_s7 }
  0x9a   : > { %p1946_p13 = scmp.ne.s32.totalorder %s2325_s27, %s1945_s26  ;;  %p1952_p8 = scmp.lt.u32.totalorder %s1950_s17, %s1945_s26 }
  0x9b   : > { %p1954_p1 = scmp.lt.u32.totalorder %s1945_s26, %s2325_s27 }
  0x9c   : > { %p1948_p3 = pnand %p1946_p13, %p1917_p11  ;;  %p1953_p10 = por %p1952_p8, %p1951_p9 }
  0x9e   : > { %p1949_p6 = pneg %p1948_p3  ;;  %p1955_p4 = por %p1954_p1, %p1953_p10 }
  0xa0   : > { %p1956_p5 = pnand %p1955_p4, %p1949_p6 }
  0xa2   : > { %1959 = shalt.err (!%p1956_p5)
}
  0xa3   : > { %s1960_s30 = scalar_lea.vmem %s673_s16, 16  ;;  %s2027_s1 = smov [#allocation4]  }
  0xa4   : > { %p1961_p12 = scmp.ne.s32.totalorder %s673_s16, %s1960_s30  ;;  %s1965_s2 = sshll.u32 %s2027_s1, 4  ;;  %s1966_s2 = int_to_ptr.vmem [resolvable:$false] %s1965_s2 }
  0xa5   : > { %s1967_s22 = scalar_lea.vmem %s1966_s2, 32  ;;  %p1968_p13 = scmp.lt.s32.totalorder %s673_s16, %s1966_s2 }
  0xa6   : > { %p1963_p0 = pnand %p1961_p12, %p1917_p11  ;;  %p1969_p3 = scmp.lt.s32.totalorder %s1967_s22, %s1960_s30 }
  0xa8   : > { %p1964_p2 = pneg %p1963_p0  ;;  %p1970_p8 = por %p1969_p3, %p1968_p13 }
  0xaa   : > { %p1971_p9 = pnand %p1970_p8, %p1964_p2 }
  0xac   : > { %1974 = shalt.err (!%p1971_p9)
}
  0xad   : > { %1758 = dma.hbm_to_vmem [thread:$0]  (!%p2289_p7), %s2325_s27, 16, %s673_s16, %s663_s19  }
  0xae   : > { %p2597_p6 = scmp.ne.s32.totalorder %s2587_s23, 0 }
  0xaf   : > { %s2351_s26 = sand.u32 (!%p2597_p6), 1, %s2013_s28   ;;  %p2598_p11 = scmp.ne.s32.totalorder (!%p2597_p6), %s2586_s0, 0 }
  0xb0   : > { %681 = sbr.rel (%p2597_p6) target bundleno = 3112 (0xc28), region = 100  ;;  %s1594_s21 = sshll.u32 (!%p2597_p6), %s2351_s26, 2 }
  0xb1   : > { %s684_s20 = scalar_lea.sflag (!%p2597_p6), [#allocation3], %s2351_s26  ;;  %s687_s6 = scalar_lea.vmem (!%p2597_p6), [#allocation2], %s1594_s21 }
  0xb7   : > { %1992 = dma.done.wait (%p2598_p11), %s684_s20, 64  }
  0xb8   : > { %1994 = vsyncadd (%p2598_p11), %s684_s20, 4294967232  ;;  %s692_s18 = sand.u32 1, %s2164_s4   ;;  %s695_s16 = scalar_lea.vmem [#allocation4], %s2351_s26 }
  0xb9   : > { %s693_s23 = scalar_lea.sflag [#allocation5], %s692_s18 }
  0xba   : > { %1996 = dma.done.wait (%p2598_p11), %s693_s23, 16  }
  0xbb   : > { %1998 = vsyncadd (%p2598_p11), %s693_s23, 4294967280  ;;  %p2599_p7 = scmp.eq.s32.totalorder %s2164_s4, 0 }
  0xbd   : > { %2000 = dma.done.wait (%p2599_p7), [#allocation5], 16   ;;  %p2600_p10 = pmov %p2599_p7 }
  0xbe   : > { %p2601_p1 = pmov %p2599_p7 }
  0xbf   : > { %2002 = vsyncadd (%p2600_p10), [#allocation5], 4294967280 }
  0xc0   : > { %2004 = dma.done.wait (%p2601_p1), [#allocation8], 32   ;;  %p2602_p4 = pmov %p2601_p1 }
  0xc1   : > { %v2028_v0 = vmov 0.0   ;;  %vm2029_vm0 = vmmov 0   ;;  %s2603_s19 = sld [smem:[#allocation18_spill]]  ;;  %v2386_v3 = vld [vmem:[%s687_s6] sm:$0xf]  ;;  %s2604_s1 = sld [smem:[#allocation20_spill]] }
  0xc2   : > { %2006 = vsyncadd (%p2602_p4), [#allocation8], 4294967264  ;;  %1654 = vmatprep.subr.bf16.mxu0 %v2028_v0  ;;  %1658 = vmatprep.mubr.msk.bf16.mxu0 %vm2029_vm0, %v2028_v0  ;;  %vm810_vm1 = vcmask 261120   ;;  %s2605_s21 = sld [smem:[#allocation16_spill]]  ;;  %v1598_v8 = vld [vmem:[#allocation7] ss:$0 sm:$0xff]  ;;  %v1147_v56 = vunpack.c.l.bf16 %v2386_v3 }
  0xc3   : > { %1662 = vmatprep.subr.bf16.mxu1 %v2028_v0  ;;  %1666 = vmatprep.mubr.msk.bf16.mxu1 %vm2029_vm0, %v2028_v0  ;;  %v1602_v15 = vld [vmem:[#allocation9] ss:$0 sm:$0xff]  ;;  %v921_v18 = vld [vmem:[#allocation6] sm:$0x1]  ;;  %vm1042_vm2 = vcmask 1043456   ;;  %vm1024_vm3 = vcmask 57344  }
  0xc4   : > { %v977_v32 = vld [vmem:[%s695_s16] sm:$0x1]  ;;  %vm1038_vm4 = vcmask 64512   ;;  %v1810_v49 = vld [vmem:[%s2542_s8 + $0x8] sm:$0xff]   ;;  %vm1151_vm5 = vcmask 253952   ;;  %vm1264_vm6 = vcmask 523264  }
  0xc5   : > { %v1809_v44 = vld [vmem:[%s2542_s8] sm:$0xff]   ;;  %s2606_s0 = sld [smem:[#allocation24_spill]]  ;;  %p776_p5 = scmp.lt.s32.totalorder %s2164_s4, 1  ;;  %vm1419_vm7 = vsmask.f32 256  ;;  %vm1387_vm9 = vcmask 24576  }
  0xc6   : > { %v1091_v55 = vld [vmem:[%s2543_s9] sm:$0x1]  ;;  %s2607_s5 = sld [smem:[#allocation22_spill]]  ;;  %s2608_s2 = sld [smem:[#allocation23_spill]]  ;;  %vm1420_vm8 = vmand %vm1151_vm5, %vm1419_vm7  ;;  %vm1424_vm12 = vcmask 0  }
  0xc7   : > { %v1803_v1 = vld [vmem:[%s2603_s19] sm:$0xff]   ;;  %v1804_v2 = vld [vmem:[%s2603_s19 + $0x8] sm:$0xff]   ;;  %s2619_s4 = smov (!%p776_p5, %s2164_s4), 1  ;;  %s2609_s18 = sld [smem:[#allocation26_spill]] }
  0xc8   : > { %1655 = vmatpush3.bf16.msra.mxu0 %v1803_v1  ;;  %v1807_v4 = vld [vmem:[%s2604_s1] sm:$0xff]   ;;  %v1808_v6 = vld [vmem:[%s2604_s1 + $0x8] sm:$0xff]   ;;  %s2610_s26 = sld [smem:[#allocation25_spill]]  ;;  %s2612_s22 = sld [smem:[#allocation28_spill]] }
  0xc9   : > { %1656 = vmatprep.subr.bf16.mxu0 %v2028_v0  ;;  %v1805_v5 = vld [vmem:[%s2605_s21] sm:$0xff]   ;;  %1663 = vmatpush3.bf16.msra.mxu1 %v1807_v4  ;;  %v1806_v7 = vld [vmem:[%s2605_s21 + $0x8] sm:$0xff]  }
  0xca   : > { %1664 = vmatprep.subr.bf16.mxu1 %v2028_v0 }
  0xcc   : > { %1657 = vmatpush3.bf16.msra.mxu0 %v1804_v2 }
  0xcd   : > { %1670 = vmatprep.subr.bf16.mxu0 %v2028_v0  ;;  %1665 = vmatpush3.bf16.msra.mxu1 %v1808_v6  ;;  %s778_s23 = scalar_lea.vmem %s2609_s18, %s2619_s4 }
  0xce   : > { %1678 = vmatprep.subr.bf16.mxu1 %v2028_v0  ;;  %s784_s20 = scalar_lea.vmem %s2612_s22, %s2619_s4 }
  0xcf   : > { %1659 = vmatmul.mubr.msk.bf16.vlgmr.msra.gmra.mrb[0].mxu0 %vm810_vm1, %v2386_v3 }
  0xd0   : > { %1671 = vmatpush3.bf16.msra.mxu0 %v1805_v5  ;;  %1674 = vmatprep.mubr.msk.bf16.mxu0 %vm2029_vm0, %v2028_v0 }
  0xd1   : > { %1672 = vmatprep.subr.bf16.mxu0 %v2028_v0  ;;  %1667 = vmatmul.mubr.msk.bf16.vlgmr.msra.gmra.mrb[0].mxu1 %vm810_vm1, %v2386_v3 }
  0xd2   : > { %1680 = vmatprep.mubr.msk.bf16.mxu1 %vm2029_vm0, %v2028_v0 }
  0xd4   : > { %1673 = vmatpush3.bf16.msra.mxu0 %v1806_v7  ;;  %v1812_v7 = vld [vmem:[%s2546_s12 + $0x8] sm:$0xff]  }
  0xd5   : > { %1684 = vmatprep.subr.bf16.mxu0 %v2028_v0 }
  0xd7   : > { %1675 = vmatmul.mubr.msk.bf16.vlgmr.msra.gmra.mrb[4].mxu0 %vm810_vm1, %v2386_v3  ;;  %v1811_v3 = vld [vmem:[%s2546_s12] sm:$0xff]  }
  0xd8   : > { %1686 = vmatprep.mubr.msk.bf16.mxu0 %vm2029_vm0, %v2028_v0 }
 0x1a2   : > { %v848_v9 = vpop.f32.mrb[0].mxu0 }
 0x1a3   : > { %v849_v10 = vadd.f32 %v1598_v8, %v848_v9  ;;  %v1660_v11 = vpop.f32.mrb[1].mxu0  ;;  %v1813_v8 = vld [vmem:[%s2548_s14] sm:$0xff]   ;;  %v1814_v9 = vld [vmem:[%s2548_s14 + $0x8] sm:$0xff]  }
 0x1a4   : > { %v851_v12 = vpop.f32.mrb[2].mxu0  ;;  %v911_v17 = vpop.f32.mrb[0].mxu1 }
 0x1a5   : > { %v976_v13 = vpack.c.bf16 %v849_v10, %v849_v10  ;;  %v1661_v14 = vpop.f32.mrb[3].mxu0  ;;  %v912_v19 = vadd.f32 %v1602_v15, %v911_v17  ;;  %v1668_v20 = vpop.f32.mrb[1].mxu1 }
 0x1a6   : > { %v914_v21 = vpop.f32.mrb[2].mxu1  ;;  %v1149_v14 = vld [vmem:[%s2544_s10] sm:$0x1]  ;;  %v1815_v20 = vld [vmem:[%s2548_s14 + $0x10] sm:$0xff]  }
 0x1a7   : > { %v982_v16 = vsel %vm810_vm1, %v976_v13, 0  ;;  %v1037_v23 = vpack.c.bf16 %v912_v19, %v912_v19  ;;  %v1669_v24 = vpop.f32.mrb[3].mxu1  ;;  %v1816_v21 = vld [vmem:[%s2548_s14 + $0x18] sm:$0xff]  }
 0x1a8   : > { %1679 = vmatpush3.bf16.xpose.msra.mxu1 %v982_v16  ;;  %v1150_v16 = vld [vmem:[%s2545_s11] sm:$0x1] }
 0x1a9   : > { %1690 = vmatprep.subr.bf16.mxu1 %v2028_v0  ;;  %v1044_v28 = vsel %vm1042_vm2, %v1037_v23, 0 }
 0x1aa   : > { %v968_v22 = vpop.f32.mrb[4].mxu0  ;;  %1685 = vmatpush3.bf16.msra.mxu0 %v1044_v28 }
 0x1ab   : > { %v969_v25 = vadd.f32 %v968_v22, %v921_v18  ;;  %v1676_v26 = vpop.f32.mrb[5].mxu0  ;;  %1698 = vmatprep.subr.bf16.mxu0 %v2028_v0  ;;  %v1173_v22 = vld [vmem:[%s2547_s13] sm:$0x1] }
 0x1ac   : > { %v971_v27 = vpop.f32.mrb[6].mxu0 }
 0x1ad   : > { %v974_v29 = vmul.f32 0.17677669, %v969_v25  ;;  %v1677_v30 = vpop.f32.mrb[7].mxu0 }
 0x1ae   : > { %v1239_v30 = vld [vmem:[%s2549_s15] sm:$0x1] }
 0x1af   : > { %v975_v31 = vpack.c.bf16 %v974_v29, %v974_v29 }
 0x1b1   : > { %1681 = vmatmul.mubr.msk.bf16.vlgmr.msra.gmra.mrb[4].mxu1 %vm810_vm1, %v975_v31 }
 0x1b2   : > { %1694 = vmatprep.mubr.msk.bf16.mxu1 %vm2029_vm0, %v2028_v0  ;;  %1691 = vmatpush3.bf16.msra.mxu1 %v1809_v44  ;;  %v1818_v44 = vld [vmem:[%s2606_s0 + $0x8] sm:$0xff]  }
 0x1b3   : > { %1692 = vmatprep.subr.bf16.mxu1 %v2028_v0 }
 0x1b6   : > { %1693 = vmatpush3.bf16.msra.mxu1 %v1810_v49  ;;  %v1309_v49 = vld [vmem:[%s2607_s5] sm:$0x1]  ;;  %s2611_s5 = sld [smem:[#allocation27_spill]] }
 0x1b7   : > { %1706 = vmatprep.subr.bf16.mxu1 %v2028_v0 }
 0x1bc   : > { %s781_s25 = scalar_lea.vmem %s2611_s5, %s2619_s4 }
 0x284   : > { %v1018_v33 = vpop.f32.mrb[4].mxu1 }
 0x285   : > { %v1019_v34 = vadd.f32 %v1018_v33, %v977_v32  ;;  %v1682_v35 = vpop.f32.mrb[5].mxu1 }
 0x286   : > { %v1021_v36 = vpop.f32.mrb[6].mxu1 }
 0x287   : > { %v1683_v37 = vpop.f32.mrb[7].mxu1  ;;  %v1025_v38 = vsel %vm1024_vm3, %v1019_v34, -inf }
 0x288   : > { %1026 = vmax.xlane.f32.xlu0 %v1025_v38 }
 0x315   : > { %v1027_v39 = vpop.xlane.xlu0 %1026 }
 0x316   : > { %v1028_v40 = vsub.f32 %v1019_v34, %v1027_v39 }
 0x318   : > { %v1029_v41 = vmul.f32 1.442695, %v1028_v40 }
 0x31a   : > { %1819 = vpow2.f32 %v1029_v41 }
 0x324   : > { %v1820_v42 = vpop.eup %1819 }
 0x325   : > { %v1031_v43 = vsel %vm1024_vm3, %v1820_v42, 0.0 }
 0x326   : > { %1032 = vadd.xlane.f32.xlu0 %v1031_v43  ;;  %v1817_v43 = vld [vmem:[%s2606_s0] sm:$0xff]  }
 0x3b3   : > { %v1033_v45 = vpop.xlane.xlu0 %1032 }
 0x3b4   : > { %1821 = vrcp.f32 %v1033_v45 }
 0x3be   : > { %v1822_v46 = vpop.eup %1821 }
 0x3bf   : > { %v1035_v47 = vmul.f32 %v1822_v46, %v1820_v42 }
 0x3c1   : > { %v1036_v48 = vpack.c.bf16 %v1035_v47, %v1035_v47 }
 0x3c3   : > { %1687 = vmatmul.mubr.msk.bf16.vlgmr.msra.gmra.mrb[8].mxu0 %vm1038_vm4, %v1036_v48 }
 0x3c4   : > { %1702 = vmatprep.mubr.msk.bf16.mxu0 %vm2029_vm0, %v2028_v0  ;;  %1699 = vmatpush3.bf16.msra.mxu0 %v1811_v3 }
 0x3c5   : > { %1700 = vmatprep.subr.bf16.mxu0 %v2028_v0 }
 0x3c8   : > { %1701 = vmatpush3.bf16.msra.mxu0 %v1812_v7 }
 0x3c9   : > { %1718 = vmatprep.subr.bf16.mxu0 %v2028_v0 }
 0x496   : > { %v1080_v50 = vpop.f32.mrb[8].mxu0 }
 0x497   : > { %v1086_v51 = vpack.c.bf16 %v1080_v50, %v1080_v50  ;;  %v1688_v52 = vpop.f32.mrb[9].mxu0 }
 0x498   : > { %v1083_v53 = vpop.f32.mrb[10].mxu0 }
 0x499   : > { %v1689_v54 = vpop.f32.mrb[11].mxu0  ;;  %1695 = vmatmul.mubr.msk.bf16.vlgmr.msra.gmra.mrb[8].mxu1 %vm810_vm1, %v1086_v51  ;;  %v1310_v51 = vld [vmem:[%s2608_s2] sm:$0x1] }
 0x49a   : > { %1714 = vmatprep.mubr.msk.bf16.mxu1 %vm2029_vm0, %v2028_v0  ;;  %1707 = vmatpush3.bf16.msra.mxu1 %v1813_v8  ;;  %v1421_v53 = vld [vmem:[%s778_s23] sm:$0x1] }
 0x49b   : > { %1708 = vmatprep.subr.bf16.mxu1 %v2028_v0 }
 0x49e   : > { %1709 = vmatpush3.bf16.msra.mxu1 %v1814_v9 }
 0x49f   : > { %1710 = vmatprep.subr.bf16.mxu1 %v2028_v0 }
 0x4a2   : > { %1711 = vmatpush3.bf16.msra.mxu1 %v1815_v20 }
 0x4a3   : > { %1712 = vmatprep.subr.bf16.mxu1 %v2028_v0 }
 0x4a6   : > { %1713 = vmatpush3.bf16.msra.mxu1 %v1816_v21 }
 0x56c   : > { %v1141_v57 = vpop.f32.mrb[8].mxu1 }
 0x56d   : > { %v1142_v58 = vadd.f32 %v1141_v57, %v1091_v55  ;;  %v1696_v59 = vpop.f32.mrb[9].mxu1 }
 0x56e   : > { %v1144_v60 = vpop.f32.mrb[10].mxu1 }
 0x56f   : > { %v1697_v61 = vpop.f32.mrb[11].mxu1  ;;  %v1148_v62 = vadd.f32 %v1147_v56, %v1142_v58  ;;  %v1331_v56 = vld [vmem:[%s2610_s26] sm:$0x1] }
 0x571   : > { %v1152_v63 = vsel %vm1151_vm5, %v1148_v62, 0.0 }
 0x572   : > { %1153 = vadd.xlane.f32.xlu1 %v1152_v63  ;;  %v1399_v63 = vlaneseq }
 0x5ff   : > { %v1154_v1 = vpop.xlane.xlu1 %1153 }
 0x600   : > { %v1156_v2 = vmul.f32 0.03125, %v1154_v1  ;;  %v1400_v1 = vand.u32 127, %v1399_v63 }
 0x602   : > { %v1157_v4 = vsub.f32 %v1148_v62, %v1156_v2 }
 0x604   : > { %v1158_v5 = vmul.f32 %v1157_v4, %v1157_v4 }
 0x606   : > { %v1159_v6 = vsel %vm1151_vm5, %v1158_v5, 0.0 }
 0x607   : > { %1160 = vadd.xlane.f32.xlu1 %v1159_v6 }
 0x694   : > { %v1161_v10 = vpop.xlane.xlu1 %1160 }
 0x695   : > { %v1162_v11 = vmul.f32 0.03125, %v1161_v10 }
 0x697   : > { %v1163_v12 = vadd.f32 1e-05, %v1162_v11 }
 0x699   : > { %1823 = vrsqrt.f32 %v1163_v12 }
 0x6a3   : > { %v1824_v13 = vpop.eup %1823 }
 0x6a4   : > { %v1165_v15 = vmul.f32 %v1824_v13, %v1157_v4 }
 0x6a6   : > { %v1166_v17 = vmul.f32 %v1165_v15, %v1149_v14 }
 0x6a8   : > { %v1167_v18 = vadd.f32 %v1166_v17, %v1150_v16 }
 0x6aa   : > { %v1168_v19 = vpack.c.bf16 %v1167_v18, %v1167_v18 }
 0x6ac   : > { %1703 = vmatmul.mubr.msk.bf16.vlgmr.msra.gmra.mrb[12].mxu0 %vm810_vm1, %v1168_v19 }
 0x6ad   : > { %1722 = vmatprep.mubr.msk.bf16.mxu0 %vm2029_vm0, %v2028_v0  ;;  %1719 = vmatpush3.bf16.msra.mxu0 %v1817_v43 }
 0x6ae   : > { %1720 = vmatprep.subr.bf16.mxu0 %v2028_v0 }
 0x6b1   : > { %1721 = vmatpush3.bf16.msra.mxu0 %v1818_v44 }
 0x77f   : > { %v1223_v23 = vpop.f32.mrb[12].mxu0 }
 0x780   : > { %v1224_v24 = vadd.f32 %v1223_v23, %v1173_v22  ;;  %v1704_v25 = vpop.f32.mrb[13].mxu0 }
 0x781   : > { %v1226_v26 = vpop.f32.mrb[14].mxu0 }
 0x782   : > { %v1229_v27 = vmax.f32 %v1224_v24, 0.0  ;;  %v1705_v28 = vpop.f32.mrb[15].mxu0 }
 0x784   : > { %v1230_v29 = vpack.c.bf16 %v1229_v27, %v1229_v27 }
 0x786   : > { %1715 = vmatmul.mubr.msk.bf16.vlgmr.msra.gmra.mrb[12].mxu1 %vm1264_vm6, %v1230_v29 }
 0x859   : > { %v1302_v31 = vpop.f32.mrb[12].mxu1 }
 0x85a   : > { %v1303_v32 = vadd.f32 %v1302_v31, %v1239_v30  ;;  %v1716_v33 = vpop.f32.mrb[13].mxu1 }
 0x85b   : > { %v1305_v34 = vpop.f32.mrb[14].mxu1 }
 0x85c   : > { %v1717_v35 = vpop.f32.mrb[15].mxu1  ;;  %v1308_v36 = vadd.f32 %v1303_v32, %v1167_v18 }
 0x85e   : > { %v1311_v37 = vsel %vm1151_vm5, %v1308_v36, 0.0 }
 0x85f   : > { %1312 = vadd.xlane.f32.xlu0 %v1311_v37 }
 0x8ec   : > { %v1313_v38 = vpop.xlane.xlu0 %1312 }
 0x8ed   : > { %v1314_v39 = vmul.f32 0.03125, %v1313_v38 }
 0x8ef   : > { %v1315_v40 = vsub.f32 %v1308_v36, %v1314_v39 }
 0x8f1   : > { %v1316_v41 = vmul.f32 %v1315_v40, %v1315_v40 }
 0x8f3   : > { %v1317_v42 = vsel %vm1151_vm5, %v1316_v41, 0.0 }
 0x8f4   : > { %1318 = vadd.xlane.f32.xlu1 %v1317_v42 }
 0x981   : > { %v1319_v45 = vpop.xlane.xlu1 %1318 }
 0x982   : > { %v1320_v46 = vmul.f32 0.03125, %v1319_v45 }
 0x984   : > { %v1321_v47 = vadd.f32 1e-05, %v1320_v46 }
 0x986   : > { %1825 = vrsqrt.f32 %v1321_v47 }
 0x990   : > { %v1826_v48 = vpop.eup %1825 }
 0x991   : > { %v1323_v50 = vmul.f32 %v1826_v48, %v1315_v40 }
 0x993   : > { %v1324_v0 = vmul.f32 %v1323_v50, %v1309_v49 }
 0x995   : > { %v1325_v52 = vadd.f32 %v1324_v0, %v1310_v51 }
 0x997   : > { %v1326_v54 = vpack.c.bf16 %v1325_v52, %v1325_v52 }
 0x999   : > { %1723 = vmatmul.mubr.msk.bf16.vlgmr.msra.gmra.mrb[16].mxu0 %vm810_vm1, %v1326_v54  ;;  %v1422_v55 = vsel %vm1420_vm8, %v1326_v54, %v1421_v53 }
 0x99a   : > { %1423 = vst [vmem:[%s778_s23] sm:$0x1] %v1422_v55 }
 0xa6c   : > { %v1381_v57 = vpop.f32.mrb[16].mxu0 }
 0xa6d   : > { %v1382_v58 = vadd.f32 %v1381_v57, %v1331_v56  ;;  %v1724_v59 = vpop.f32.mrb[17].mxu0 }
 0xa6e   : > { %v1384_v60 = vpop.f32.mrb[18].mxu0 }
 0xa6f   : > { %v1725_v61 = vpop.f32.mrb[19].mxu0  ;;  %v1388_v62 = vsel %vm1387_vm9, %v1382_v58, -inf }
 0xa70   : > { %1389 = vmax.xlane.f32.xlu0 %v1388_v62 }
 0xafd   : > { %v1390_v2 = vpop.xlane.xlu0 %1389 }
 0xafe   : > { %v1391_v4 = vsub.f32 %v1382_v58, %v1390_v2  ;;  %vm1401_vm10 = vcmp.eq.f32.partialorder %v1382_v58, %v1390_v2 }
 0xaff   : > { %v1402_v5 = vsel %vm1401_vm10, %v1400_v1, 4 }
 0xb00   : > { %v1392_v6 = vmul.f32 1.442695, %v1391_v4  ;;  %v1403_v3 = vsel %vm1387_vm9, %v1402_v5, 2147483647 }
 0xb01   : > { %v1405_v7 = vshra.s32 %v1403_v3, 16  ;;  %v1404_v11 = vand.u32 65535, %v1403_v3 }
 0xb02   : > { %1827 = vpow2.f32 %v1392_v6 }
 0xb03   : > { %v1407_v8 = vcvt.s32.f32 %v1405_v7  ;;  %v1406_v13 = vcvt.s32.f32 %v1404_v11 }
 0xb05   : > { %1408 = vmin.xlane.f32.xlu1 %v1407_v8 }
 0xb0c   : > { %v1828_v9 = vpop.eup %1827 }
 0xb0d   : > { %v1394_v10 = vsel %vm1387_vm9, %v1828_v9, 0.0 }
 0xb0e   : > { %1395 = vadd.xlane.f32.xlu0 %v1394_v10 }
 0xb92   : > { %v1409_v12 = vpop.xlane.xlu1 %1408 }
 0xb93   : > { %vm1410_vm11 = vcmp.eq.f32.partialorder %v1407_v8, %v1409_v12  ;;  %v1415_v17 = vcvt.f32.s32 %v1409_v12 }
 0xb94   : > { %v1411_v14 = vsel %vm1410_vm11, %v1406_v13, inf }
 0xb95   : > { %1412 = vmin.xlane.f32.xlu1 %v1411_v14  ;;  %v1416_v19 = vshll.u32 %v1415_v17, 16 }
 0xb9b   : > { %v1396_v15 = vpop.xlane.xlu0 %1395 }
 0xb9c   : > { %1829 = vrcp.f32 %v1396_v15 }
 0xba6   : > { %v1830_v16 = vpop.eup %1829 }
 0xba7   : > { %1425 = vst.msk [vmem:[%s781_s25] sm:$0x1] %vm1424_vm12, %v1830_v16 }
 0xc22   : > { %v1413_v18 = vpop.xlane.xlu1 %1412 }
 0xc23   : > { %v1414_v20 = vcvt.f32.s32 %v1413_v18 }
 0xc25   : > { %v1417_v21 = vadd.s32 %v1416_v19, %v1414_v20 }
 0xc27   : > { %1426 = vst.msk [vmem:[%s784_s20] sm:$0x1] %vm1424_vm12, %v1417_v21 }
 0xc28 PF: > { %s2613_s18 = smov %s2275_s3  ;;  %p37_p12 = scmp.ge.s32.totalorder %s2265_s24, 4  }
 0xc29   : > { %s2614_s3 = smov %s2013_s28  ;;  %s2615_s28 = smov %s2017_s29 }
 0xc2a   : > { %s2616_s29 = smov %s2613_s18  ;;  %s2617_s30 = smov %s2265_s24 }
 0xc2b   :  { %39 = sbr.rel (!%p37_p12) target bundleno = 22 (0x16), region = 189 }
 0xc32   :  { %1468 = vsyncpa [#allocation3], 1 }
 0xc33   :  { %1470 = vsyncpa [#allocation3 + $0x1], 1 }
 0xc34   :  { %1471 = vsyncpa [#allocation5], 1 }
 0xc35   :  { %1473 = vsyncpa [#allocation5 + $0x1], 1 }
 0xc36   :  { %1474 = vsyncpa [#allocation8], 1 }

</bundles_post_ra>
